<compile_context>
chip_gen: v5e
topology: v5e:2x2
jax: 0.10.0
libtpu: 0.0.40
codegen_flags: <defaults>
</compile_context>

<pallas_src>
import jax
import jax.numpy as jnp
from jax.experimental import pallas as pl
from jax.experimental.pallas import tpu as pltpu

IN_FEATURES = 5
OUT_FEATURES = 2


def linear_kernel(x_ref, w_ref, b_ref, o_ref):
    # x_ref: [B, IN]   w_ref: [IN, OUT]   b_ref: [1, OUT]   o_ref: [B, OUT]
    x = x_ref[...].astype(jnp.float32)
    w = w_ref[...].astype(jnp.float32)
    acc = b_ref[...].astype(jnp.float32)          # [1, OUT] -> broadcasts to [B, OUT]
    # Unrolled VPU FMA chain over the K=5 contraction (no MXU fill/drain).
    for k in range(IN_FEATURES):
        acc = acc + x[:, k:k + 1] * w[k:k + 1, :]
    o_ref[...] = acc.astype(o_ref.dtype)


def linear_pallas(x, w_io, b_2d):
    """x: [B, IN]; w_io: [IN, OUT] (pre-transposed once at init); b_2d: [1, OUT]."""
    B = x.shape[0]
    return pl.pallas_call(
        linear_kernel,
        out_shape=jax.ShapeDtypeStruct((B, OUT_FEATURES), x.dtype),
        in_specs=[
            pl.BlockSpec(memory_space=pltpu.MemorySpace.VMEM),
            pl.BlockSpec(memory_space=pltpu.MemorySpace.VMEM),
            pl.BlockSpec(memory_space=pltpu.MemorySpace.VMEM),
        ],
        out_specs=pl.BlockSpec(memory_space=pltpu.MemorySpace.VMEM),
    )(x, w_io, b_2d)


def init_params(key):
    # Deterministic init mimicking nn.Linear default (uniform +/- 1/sqrt(fan_in)),
    # in PyTorch layout: weight [OUT, IN], bias [OUT].
    k_w, k_b = jax.random.split(key)
    bound = 1.0 / jnp.sqrt(jnp.float32(IN_FEATURES))
    weight = jax.random.uniform(
        k_w, (OUT_FEATURES, IN_FEATURES), jnp.float32, -bound, bound)
    bias = jax.random.uniform(
        k_b, (OUT_FEATURES,), jnp.float32, -bound, bound)
    return weight, bias


def prepare_params(weight, bias):
    """One-time layout prep (kernel-friendly): W^T [IN, OUT], bias [1, OUT]."""
    return weight.T, bias.reshape(1, OUT_FEATURES)


if __name__ == "__main__":
    key = jax.random.PRNGKey(0)
    k_x, k_p = jax.random.split(key)
    B = 8
    x = jax.random.normal(k_x, (B, IN_FEATURES), jnp.float32)
    weight, bias = init_params(k_p)
    w_io, b_2d = prepare_params(weight, bias)   # done once, not per call

    out = linear_pallas(x, w_io, b_2d)
    out = jax.block_until_ready(out)

    # Sanity check against plain JAX reference (PyTorch semantics: x @ W^T + b).
    ref = x @ weight.T + bias
    assert out.shape == (B, OUT_FEATURES)
    assert jnp.allclose(out, ref, atol=1e-5, rtol=1e-5)
    print("KERNEL_OK")
</pallas_src>

<mosaic_0001>
module attributes {stable_mosaic.version = 11 : i64} {
  func.func @linear_kernel(%arg0: memref<8x5xf32, #tpu.memory_space<vmem>>, %arg1: memref<5x2xf32, #tpu.memory_space<vmem>>, %arg2: memref<1x2xf32, #tpu.memory_space<vmem>>, %arg3: memref<8x2xf32, #tpu.memory_space<vmem>>) attributes {dimension_semantics = [], scalar_prefetch = 0 : i64, scratch_operands = 0 : i64, tpu.core_type = #tpu.core_type<tc>} {
    %c0 = arith.constant 0 : index
    %c0_0 = arith.constant 0 : index
    %0 = vector.load %arg0[%c0, %c0_0] : memref<8x5xf32, #tpu.memory_space<vmem>>, vector<8x5xf32>
    %c0_1 = arith.constant 0 : index
    %c0_2 = arith.constant 0 : index
    %1 = vector.load %arg1[%c0_1, %c0_2] : memref<5x2xf32, #tpu.memory_space<vmem>>, vector<5x2xf32>
    %c0_3 = arith.constant 0 : index
    %c0_4 = arith.constant 0 : index
    %2 = vector.load %arg2[%c0_3, %c0_4] : memref<1x2xf32, #tpu.memory_space<vmem>>, vector<1x2xf32>
    %3 = vector.extract_strided_slice %0 {offsets = [0, 0], sizes = [8, 1], strides = [1, 1]} : vector<8x5xf32> to vector<8x1xf32>
    %4 = vector.extract_strided_slice %1 {offsets = [0, 0], sizes = [1, 2], strides = [1, 1]} : vector<5x2xf32> to vector<1x2xf32>
    %5 = vector.broadcast %3 : vector<8x1xf32> to vector<8x2xf32>
    %6 = vector.broadcast %4 : vector<1x2xf32> to vector<8x2xf32>
    %7 = arith.mulf %5, %6 : vector<8x2xf32>
    %8 = vector.broadcast %2 : vector<1x2xf32> to vector<8x2xf32>
    %9 = arith.addf %8, %7 : vector<8x2xf32>
    %10 = vector.extract_strided_slice %0 {offsets = [0, 1], sizes = [8, 1], strides = [1, 1]} : vector<8x5xf32> to vector<8x1xf32>
    %11 = vector.extract_strided_slice %1 {offsets = [1, 0], sizes = [1, 2], strides = [1, 1]} : vector<5x2xf32> to vector<1x2xf32>
    %12 = vector.broadcast %10 : vector<8x1xf32> to vector<8x2xf32>
    %13 = vector.broadcast %11 : vector<1x2xf32> to vector<8x2xf32>
    %14 = arith.mulf %12, %13 : vector<8x2xf32>
    %15 = arith.addf %9, %14 : vector<8x2xf32>
    %16 = vector.extract_strided_slice %0 {offsets = [0, 2], sizes = [8, 1], strides = [1, 1]} : vector<8x5xf32> to vector<8x1xf32>
    %17 = vector.extract_strided_slice %1 {offsets = [2, 0], sizes = [1, 2], strides = [1, 1]} : vector<5x2xf32> to vector<1x2xf32>
    %18 = vector.broadcast %16 : vector<8x1xf32> to vector<8x2xf32>
    %19 = vector.broadcast %17 : vector<1x2xf32> to vector<8x2xf32>
    %20 = arith.mulf %18, %19 : vector<8x2xf32>
    %21 = arith.addf %15, %20 : vector<8x2xf32>
    %22 = vector.extract_strided_slice %0 {offsets = [0, 3], sizes = [8, 1], strides = [1, 1]} : vector<8x5xf32> to vector<8x1xf32>
    %23 = vector.extract_strided_slice %1 {offsets = [3, 0], sizes = [1, 2], strides = [1, 1]} : vector<5x2xf32> to vector<1x2xf32>
    %24 = vector.broadcast %22 : vector<8x1xf32> to vector<8x2xf32>
    %25 = vector.broadcast %23 : vector<1x2xf32> to vector<8x2xf32>
    %26 = arith.mulf %24, %25 : vector<8x2xf32>
    %27 = arith.addf %21, %26 : vector<8x2xf32>
    %28 = vector.extract_strided_slice %0 {offsets = [0, 4], sizes = [8, 1], strides = [1, 1]} : vector<8x5xf32> to vector<8x1xf32>
    %29 = vector.extract_strided_slice %1 {offsets = [4, 0], sizes = [1, 2], strides = [1, 1]} : vector<5x2xf32> to vector<1x2xf32>
    %30 = vector.broadcast %28 : vector<8x1xf32> to vector<8x2xf32>
    %31 = vector.broadcast %29 : vector<1x2xf32> to vector<8x2xf32>
    %32 = arith.mulf %30, %31 : vector<8x2xf32>
    %33 = arith.addf %27, %32 : vector<8x2xf32>
    %c0_5 = arith.constant 0 : index
    %c0_6 = arith.constant 0 : index
    %34 = vector.load %arg3[%c0_5, %c0_6] : memref<8x2xf32, #tpu.memory_space<vmem>>, vector<8x2xf32>
    tpu.vector_store %arg3[%c0_5, %c0_6], %33 {strides = array<i32>} : memref<8x2xf32, #tpu.memory_space<vmem>>, vector<8x2xf32>,
    return
  }
}

</mosaic_0001>

<bundles_post_ra>
// kernel: tpu_custom_call.1
= control target key start
LH: loop header
LB: loop body
LE: loop exit
PB: predicated region body
PF: predicated region fallthrough
CT: control target
= control target key end

     0   :  { %v74_v0 = vmov 0   ;;  %v75_v2 = vmov 2   ;;  %v76_v3 = vmov 4   ;;  %v77_v4 = vmov 1   ;;  %s111_s0 = inlined_call_operand.vmem [shape: f32[8,5], index: 0, kind: input, shape index: {}]   ;;  %s112_s2 = inlined_call_operand.vmem [shape: f32[1,2], index: 2, kind: input, shape index: {}]   ;;  %s113_s1 = inlined_call_operand.vmem [shape: f32[5,2], index: 1, kind: input, shape index: {}]   ;;  %s114_s3 = inlined_call_operand.vmem [shape: f32[8,2], index: 3, kind: output, shape index: {}]  }
   0x1   :  { %67 = vset.pattern.permute.xlu0 %v74_v0  ;;  %v14_v1 = vld [vmem:[%s111_s0] sm:$0xff]  ;;  %69 = vset.pattern.permute.xlu1 %v75_v2  ;;  %v78_v5 = vmov 3   ;;  %vm56_vm0 = vcmask 15360  }
   0x2   :  { %19 = vperm.xlu0 %67, %v14_v1   ;;  %36 = vperm.xlu1 %69, %v14_v1   ;;  %v15_v6 = vld [vmem:[%s113_s1] sm:$0x1f] }
   0x3   :  { %71 = vset.pattern.permute.xlu2 %v76_v3  ;;  %v22_v9 = vperm.slane %v15_v6, 0  ;;  %v73_v10 = vld [vmem:[%s112_s2] ss:$0 sm:$0xff]  ;;  %v32_v12 = vperm.slane %v15_v6, 1  ;;  %v39_v13 = vperm.slane %v15_v6, 2  ;;  %v46_v14 = vperm.slane %v15_v6, 3 }
   0x4   :  { %50 = vperm.xlu2 %71, %v14_v1   ;;  %v53_v19 = vperm.slane %v15_v6, 4 }
   0xa   :  { %68 = vset.pattern.permute.xlu0 %v77_v4  ;;  %70 = vset.pattern.permute.xlu1 %v78_v5 }
   0xb   :  { %29 = vperm.xlu0 %68, %v14_v1   ;;  %43 = vperm.xlu1 %70, %v14_v1  }
  0x13   :  { %72 = vset.pattern.permute.xlu0 %v76_v3 }
  0x5e   :  { %v51_v20 = vpop.permute.xlu2 %50 }
  0x5f   :  { %v54_v25 = vmul.f32 %v53_v19, %v51_v20 }
  0x74   :  { %v20_v7 = vpop.permute.xlu0 %19  ;;  %v37_v8 = vpop.permute.xlu1 %36 }
  0x75   :  { %v23_v11 = vmul.f32 %v22_v9, %v20_v7  ;;  %v40_v21 = vmul.f32 %v39_v13, %v37_v8 }
  0x77   :  { %v27_v17 = vadd.f32 %v73_v10, %v23_v11 }
  0x7d   :  { %v30_v15 = vpop.permute.xlu0 %29  ;;  %v44_v16 = vpop.permute.xlu1 %43 }
  0x7e   :  { %v33_v18 = vmul.f32 %v32_v12, %v30_v15  ;;  %v47_v23 = vmul.f32 %v46_v14, %v44_v16 }
  0x80   :  { %v34_v22 = vadd.f32 %v33_v18, %v27_v17 }
  0x82   :  { %v41_v24 = vadd.f32 %v40_v21, %v34_v22 }
  0x84   :  { %v48_v26 = vadd.f32 %v47_v23, %v41_v24 }
  0x86   :  { %v55_v27 = vadd.f32 %v54_v25, %v48_v26 }
  0x88   :  { %57 = vst.msk [vmem:[%s114_s3] sm:$0xff] %vm56_vm0, %v55_v27 }

</bundles_post_ra>
